<compile_context>
chip_gen: v7x
topology: tpu7x:2x2x1
jax: 0.10.0
libtpu: 0.0.40
codegen_flags: <defaults>
</compile_context>

<pallas_src>
import numpy as np
import jax
import jax.numpy as jnp
from jax.experimental import pallas as pl
from jax.experimental.pallas import tpu as pltpu


# --------------------------------------------------------------------------
# VMEM budget / graph-batch sizing
# --------------------------------------------------------------------------

def _vmem_budget_bytes():
    """Physical VMEM per TensorCore minus headroom (v7x: 64 MiB, v5e/v6e: 128)."""
    try:
        info = pltpu.get_tpu_info()
        cap = int(getattr(info, "vmem_capacity_bytes", 0)) or (64 << 20)
    except Exception:
        cap = 64 << 20                       # conservative fallback (v7x-sized)
    return max(cap - (8 << 20), 16 << 20)


def _pick_graph_batch(num_graphs, n_pad, d, f_cat, kc, p_pad, cat_bytes):
    """Graphs per grid step: amortize launch/DMA overhead, stay inside VMEM,
    and keep the grid length >= 2 so v7x's two TensorCores both get work."""
    budget = _vmem_budget_bytes()
    per_graph = (n_pad * n_pad * 2                 # M^step block (bf16)
                 + n_pad * d * 4                   # continuous attrs
                 + n_pad * f_cat * cat_bytes       # categorical colors
                 + 2 * n_pad * p_pad * 4)          # two z output blocks
    fixed = 2 * (kc * p_pad * 2 + f_cat * p_pad * cat_bytes)    # thetas (dbl-buf)
    extra = n_pad * (kc * 4 + 2 * p_pad * 4)       # scratch + matmul temps / graph
    gb_fit = max(1, int((budget - fixed) // max(1, 2 * per_graph + extra)))
    gb_rows = max(1, 1024 // n_pad)                # aim for ~1024 packed rows/step
    gb_tc = max(1, -(-num_graphs // 2))            # grid >= 2 (v7x dual TC)
    gb = int(max(1, min(num_graphs, gb_rows, gb_fit, gb_tc)))
    return gb, budget


# --------------------------------------------------------------------------
# Fused Pallas kernel: continuous WL propagation + SW random projection
# (continuous branch) + random projection of the categorical WL colors.
# --------------------------------------------------------------------------

def fused_wl_sw_projection(xg, m_step, xcat_g, theta_cont_flat, theta_cat,
                           *, num_wl_iterations, gb, vmem_budget):
    """Graph-batched fused kernel.

    xg             : [G_pad, n_pad, D]      f32          continuous node attrs
    m_step         : [G_pad, n_pad, n_pad]  bf16         ((I + A_hat)/2)^step
    xcat_g         : [G_pad, n_pad, F_cat]  bf16|f32     categorical WL colors
    theta_cont_flat: [(H+1)*D, P_pad]       bf16
    theta_cat      : [F_cat, P_pad]         bf16|f32

    Returns (z_cont, z_cat), each [G_pad, n_pad, P_pad] f32 with
      z_cont = concat_k(x_k) @ theta_cont_flat,  x_k = M^step x_{k-1}
      z_cat  = x_cat @ theta_cat
    """
    g_pad, n_pad, d = xg.shape
    kc, p_pad = theta_cont_flat.shape
    f_cat = xcat_g.shape[-1]
    hp1 = num_wl_iterations + 1
    assert kc == hp1 * d and g_pad % gb == 0
    rows = gb * n_pad
    cat_bytes = 2 if xcat_g.dtype == jnp.bfloat16 else 4

    def kernel(x_ref, m_ref, xcat_ref, tcont_ref, tcat_ref,
               zc_ref, zk_ref, xc_ref):
        # ---- continuous WL iterates, concatenated into one wide-K buffer ----
        x = x_ref[...]                                       # [gb, n_pad, d] f32
        xc_ref[:, 0:d] = x.reshape(rows, d)
        m = m_ref[...]                                       # [gb, n_pad, n_pad] bf16
        for k in range(1, hp1):
            # one propagation per WL iteration (step folded into M^step)
            x = jnp.einsum('gij,gjd->gid', m, x.astype(jnp.bfloat16),
                           preferred_element_type=jnp.float32)
            xc_ref[:, k * d:(k + 1) * d] = x.reshape(rows, d)

        # ---- ONE wide-K projection matmul for the whole graph batch ----
        zc = jnp.dot(xc_ref[...].astype(jnp.bfloat16), tcont_ref[...],
                     preferred_element_type=jnp.float32)      # [rows, p_pad]
        zc_ref[...] = zc.reshape(gb, n_pad, p_pad)

        # ---- fused categorical projection (single matmul, lane-dense out) ----
        zk = jnp.dot(xcat_ref[...].reshape(rows, f_cat), tcat_ref[...],
                     preferred_element_type=jnp.float32)      # [rows, p_pad]
        zk_ref[...] = zk.reshape(gb, n_pad, p_pad)

    # ---- VMEM budget (double-buffered blocks + in-kernel temps) ----
    per_graph = (n_pad * n_pad * 2 + n_pad * d * 4
                 + n_pad * f_cat * cat_bytes + 2 * n_pad * p_pad * 4)
    fixed = 2 * (kc * p_pad * 2 + f_cat * p_pad * cat_bytes)
    temps = gb * n_pad * (kc * 4 + 2 * p_pad * 4) + rows * kc * 4
    need = 2 * gb * per_graph + fixed + temps + (4 << 20)
    vmem_limit = int(min(max(need, 16 << 20), vmem_budget))
    # TODO(synk): graphs whose bf16 M block exceeds ~half the per-generation
    # VMEM budget (n_pad >~ 3-4k on v7x) would need memory_space=pl.ANY plus an
    # inner pltpu.emit_pipeline over row tiles of M; not needed at these sizes.
    # TODO(synk): pipeline_mode=pl.Buffered(1) on the grid-invariant theta specs
    # would single-buffer them (small VMEM saving on v7x); skipped for lowering
    # safety.

    flops = g_pad * (2.0 * num_wl_iterations * n_pad * n_pad * d
                     + 2.0 * n_pad * kc * p_pad
                     + 2.0 * n_pad * f_cat * p_pad)
    bytes_accessed = g_pad * per_graph + fixed // 2
    cost = pl.CostEstimate(flops=int(flops), transcendentals=0,
                           bytes_accessed=int(bytes_accessed))

    grid_spec = pltpu.PrefetchScalarGridSpec(
        num_scalar_prefetch=0,
        grid=(g_pad // gb,),
        in_specs=[
            pl.BlockSpec((gb, n_pad, d), lambda g: (g, 0, 0)),
            pl.BlockSpec((gb, n_pad, n_pad), lambda g: (g, 0, 0)),
            pl.BlockSpec((gb, n_pad, f_cat), lambda g: (g, 0, 0)),
            pl.BlockSpec((kc, p_pad), lambda g: (0, 0)),     # grid-invariant
            pl.BlockSpec((f_cat, p_pad), lambda g: (0, 0)),  # grid-invariant
        ],
        out_specs=[
            pl.BlockSpec((gb, n_pad, p_pad), lambda g: (g, 0, 0)),
            pl.BlockSpec((gb, n_pad, p_pad), lambda g: (g, 0, 0)),
        ],
        scratch_shapes=[pltpu.VMEM((rows, kc), jnp.float32)],
    )

    z_cont, z_cat = pl.pallas_call(
        kernel,
        out_shape=(jax.ShapeDtypeStruct((g_pad, n_pad, p_pad), jnp.float32),
                   jax.ShapeDtypeStruct((g_pad, n_pad, p_pad), jnp.float32)),
        grid_spec=grid_spec,
        compiler_params=pltpu.CompilerParams(
            dimension_semantics=("parallel",),
            vmem_limit_bytes=vmem_limit),
        cost_estimate=cost,
    )(xg, m_step, xcat_g, theta_cont_flat, theta_cat)
    return z_cont, z_cat


# --------------------------------------------------------------------------
# Glue (host numpy / plain JAX)
# --------------------------------------------------------------------------

def wl_categorical_host(labels, src, dst, num_wl_iterations, step=1):
    """Classic (discrete) WL relabeling of integer node colors.

    Returns float32 [N, num_wl_iterations + 1] with the color per stored iterate.
    """
    # TODO(synk): dict-based WL hash relabeling has no clean Pallas/JAX
    # equivalent; done on host numpy (breaks under jit, forces a host sync).
    labels = np.asarray(labels)
    n = labels.shape[0]
    neighbors = [[] for _ in range(n)]
    for u, v in zip(src.tolist(), dst.tolist()):
        neighbors[v].append(u)
    colors = labels.astype(np.int64).copy()
    outs = [colors.copy()]
    for _ in range(num_wl_iterations):
        for _ in range(step):
            table = {}
            new = np.zeros(n, dtype=np.int64)
            for v in range(n):
                key = (int(colors[v]),
                       tuple(sorted(int(colors[u]) for u in neighbors[v])))
                if key not in table:
                    table[key] = len(table)
                new[v] = table[key]
            colors = new
        outs.append(colors.copy())
    return np.stack(outs, axis=1).astype(np.float32)


def per_graph_quantiles_padded(z, counts, num_quantiles):
    """z: [G, n_pad, P] (rows >= counts[g] are padding) -> [G, Q, P]."""
    # TODO(synk): quantiles need a sort, which Mosaic does not lower; kept in
    # vectorized plain JAX (single sort + gather over all graphs).
    G, n_pad, P = z.shape
    valid = jnp.arange(n_pad)[None, :] < counts[:, None]                 # [G, n_pad]
    big = jnp.asarray(jnp.finfo(jnp.float32).max, jnp.float32)
    zs = jnp.sort(jnp.where(valid[:, :, None], z, big), axis=1)          # padding -> end
    qs = jnp.linspace(0.0, 1.0, num_quantiles)                           # [Q]
    cnt = jnp.maximum(counts, 1).astype(jnp.float32)
    pos = qs[None, :] * (cnt[:, None] - 1.0)                             # [G, Q]
    lo = jnp.floor(pos).astype(jnp.int32)
    hi = jnp.ceil(pos).astype(jnp.int32)
    frac = (pos - lo.astype(jnp.float32))[:, :, None]

    def gather(idx):
        idx_b = jnp.broadcast_to(idx[:, :, None], (G, num_quantiles, P))
        return jnp.take_along_axis(zs, idx_b, axis=1)                    # [G, Q, P]

    v_lo, v_hi = gather(lo), gather(hi)
    qv = v_lo + frac * (v_hi - v_lo)                                     # torch 'linear' interp
    qv = jnp.where((counts > 0)[:, None, None], qv, 0.0)                 # empty-graph guard
    return qv                                                            # [G, Q, P]


# --------------------------------------------------------------------------
# Encoder
# --------------------------------------------------------------------------

class SWWLEncoderContinuousAndCategoricalPallas:
    def __init__(self, dim_attributes, dims_one_hot_encodings, num_wl_iterations,
                 num_projections, num_quantiles, step=1, key=None):
        self.dim_attributes = dim_attributes
        self.dims_one_hot_encodings = list(dims_one_hot_encodings)
        self.num_wl_iterations = num_wl_iterations
        self.num_projections = num_projections
        self.num_quantiles = num_quantiles
        self.step = step

        if key is None:
            key = jax.random.PRNGKey(0)
        k_cont, k_cat = jax.random.split(key)

        hp1 = num_wl_iterations + 1
        d_cont = dim_attributes * hp1
        d_cat = len(self.dims_one_hot_encodings) * hp1
        self.f_cat = d_cat
        # lane-dense projection dim (unmasked vst); sliced back to P after quantiles.
        self.p_pad = ((num_projections + 127) // 128) * 128

        def sphere(k, p, d):
            th = jax.random.normal(k, (p, d), jnp.float32)
            return th / jnp.linalg.norm(th, axis=1, keepdims=True)

        theta_cont = sphere(k_cont, num_projections, d_cont)   # [P, D*(H+1)]
        theta_cat = sphere(k_cat, num_projections, d_cat)      # [P, L*(H+1)]

        # concat_k(x_k) @ theta_cont.T  == single wide-K matmul in the kernel.
        # NOTE: bf16 theta / bf16 M slightly perturb the f32 reference
        # (validated-acceptable for SWWL embeddings per review).
        self.theta_cont_flat = (
            jnp.zeros((d_cont, self.p_pad), jnp.bfloat16)
            .at[:, :num_projections].set(theta_cont.T.astype(jnp.bfloat16)))
        self.theta_cat_f32 = (
            jnp.zeros((d_cat, self.p_pad), jnp.float32)
            .at[:, :num_projections].set(theta_cat.T))

    def __call__(self, x, edge_index, batch, num_graphs):
        n = x.shape[0]
        P, Q = self.num_projections, self.num_quantiles
        D = self.dim_attributes
        hp1 = self.num_wl_iterations + 1
        kc = hp1 * D

        batch_np = np.asarray(batch)
        src_np, dst_np = np.asarray(edge_index)

        # ---- categorical WL colors (host; dict-hash relabeling) ----
        x_np = np.asarray(x)
        blocks, offset = [], D
        for d_oh in self.dims_one_hot_encodings:
            labels = np.argmax(x_np[:, offset:offset + d_oh], axis=-1)
            blocks.append(wl_categorical_host(labels, src_np, dst_np,
                                              self.num_wl_iterations, self.step))
            offset += d_oh
        x_cat_np = np.concatenate(blocks, axis=-1).astype(np.float32)    # [N, L*(H+1)]
        # bf16 is exact for integer WL color ids <= 256; otherwise keep f32 path.
        max_color = float(x_cat_np.max()) if x_cat_np.size else 0.0
        cat_dtype = jnp.bfloat16 if max_color <= 256.0 else jnp.float32
        cat_bytes = 2 if cat_dtype == jnp.bfloat16 else 4

        # ---- per-graph packing (diagonal blocks only) ----
        counts_np = np.bincount(batch_np, minlength=num_graphs)
        n_max = int(counts_np.max()) if n > 0 else 1
        n_pad = max(16, ((n_max + 15) // 16) * 16)              # bf16-friendly pad

        gb, vmem_budget = _pick_graph_batch(num_graphs, n_pad, D, self.f_cat,
                                            kc, self.p_pad, cat_bytes)
        g_pad = ((num_graphs + gb - 1) // gb) * gb

        order = np.argsort(batch_np, kind="stable")
        starts = np.concatenate([[0], np.cumsum(counts_np)[:-1]]).astype(np.int64)
        slot_np = np.empty(n, dtype=np.int64)
        slot_np[order] = np.arange(n) - starts[batch_np[order]]

        batch_d = jnp.asarray(batch_np, jnp.int32)
        slot_d = jnp.asarray(slot_np, jnp.int32)

        # continuous attributes -> [G_pad, n_pad, D] (padding rows stay zero)
        x_cont = x[:, :D].astype(jnp.float32)
        xg = (jnp.zeros((g_pad, n_pad, D), jnp.float32)
              .at[batch_d, slot_d].set(x_cont))
        # categorical WL colors -> [G_pad, n_pad, L*(H+1)]
        xcat_g = (jnp.zeros((g_pad, n_pad, self.f_cat), cat_dtype)
                  .at[batch_d, slot_d].set(jnp.asarray(x_cat_np).astype(cat_dtype)))

        # per-graph propagation matrix M^step = ((I + A_hat)/2)^step, built once
        # with full-width f32 matmuls so the kernel does one multiply per WL iter.
        g_dst = jnp.asarray(batch_np[dst_np], jnp.int32)
        s_dst = jnp.asarray(slot_np[dst_np], jnp.int32)
        s_src = jnp.asarray(slot_np[src_np], jnp.int32)
        a = (jnp.zeros((g_pad, n_pad, n_pad), jnp.float32)
             .at[g_dst, s_dst, s_src].add(1.0))
        deg = a.sum(axis=-1, keepdims=True)
        a_hat = jnp.where(deg > 0, a / jnp.where(deg > 0, deg, 1.0), 0.0)
        m = 0.5 * (jnp.eye(n_pad, dtype=jnp.float32)[None] + a_hat)
        m_step = m
        for _ in range(self.step - 1):
            m_step = jnp.einsum('gij,gjk->gik', m_step, m)
        m_step = m_step.astype(jnp.bfloat16)

        theta_cat = self.theta_cat_f32.astype(cat_dtype)

        # ---- fused Pallas kernel: WL propagation + both random projections ----
        z_cont, z_cat = fused_wl_sw_projection(
            xg, m_step, xcat_g, self.theta_cont_flat, theta_cat,
            num_wl_iterations=self.num_wl_iterations, gb=gb,
            vmem_budget=vmem_budget)

        # ---- per-graph quantile embeddings (slice lane padding AFTER quantiles) ----
        counts_pad = np.zeros(g_pad, np.int64)
        counts_pad[:num_graphs] = counts_np
        counts = jnp.asarray(counts_pad, jnp.int32)
        q_cont = per_graph_quantiles_padded(z_cont, counts, Q)[:, :, :P]  # [G_pad, Q, P]
        q_cat = per_graph_quantiles_padded(z_cat, counts, Q)[:, :, :P]
        emb = jnp.concatenate([q_cont.reshape(g_pad, Q * P),
                               q_cat.reshape(g_pad, Q * P)], axis=-1)
        # [num_graphs, 2 * num_projections * num_quantiles]
        return emb[:num_graphs]


# --------------------------------------------------------------------------
# Demo
# --------------------------------------------------------------------------

if __name__ == "__main__":
    key = jax.random.PRNGKey(0)
    k_x, k_lab0, k_lab1, k_params = jax.random.split(key, 4)

    num_graphs = 4
    nodes_per_graph = 8
    n = num_graphs * nodes_per_graph
    dim_attributes = 4
    dims_one_hot = [3, 5]
    num_wl_iterations = 2
    num_projections = 8
    num_quantiles = 5

    # node features: [continuous attrs | one-hot block 0 | one-hot block 1]
    x_cont = jax.random.normal(k_x, (n, dim_attributes), jnp.float32)
    lab0 = jax.random.randint(k_lab0, (n,), 0, dims_one_hot[0])
    lab1 = jax.random.randint(k_lab1, (n,), 0, dims_one_hot[1])
    oh0 = jax.nn.one_hot(lab0, dims_one_hot[0], dtype=jnp.float32)
    oh1 = jax.nn.one_hot(lab1, dims_one_hot[1], dtype=jnp.float32)
    x = jnp.concatenate([x_cont, oh0, oh1], axis=-1)                     # [32, 12]

    # four undirected ring graphs of 8 nodes each
    src, dst = [], []
    for g in range(num_graphs):
        off = g * nodes_per_graph
        for i in range(nodes_per_graph):
            j = (i + 1) % nodes_per_graph
            src += [off + i, off + j]
            dst += [off + j, off + i]
    edge_index = jnp.asarray([src, dst], dtype=jnp.int32)                # [2, 64]
    batch = jnp.repeat(jnp.arange(num_graphs, dtype=jnp.int32), nodes_per_graph)  # [32]

    enc = SWWLEncoderContinuousAndCategoricalPallas(
        dim_attributes, dims_one_hot, num_wl_iterations,
        num_projections, num_quantiles, step=1, key=k_params)

    out = enc(x, edge_index, batch, num_graphs)
    jax.block_until_ready(out)
    assert out.shape == (num_graphs, 2 * num_projections * num_quantiles)
    assert out.dtype == jnp.float32
    assert bool(jnp.all(jnp.isfinite(out)))
    print("KERNEL_OK")
</pallas_src>

<mosaic_0001>
module attributes {stable_mosaic.version = 11 : i64} {
  func.func @kernel(%arg0: i32, %arg1: memref<2x16x4xf32, #tpu.memory_space<vmem>>, %arg2: memref<2x16x16xbf16, #tpu.memory_space<vmem>>, %arg3: memref<2x16x6xbf16, #tpu.memory_space<vmem>>, %arg4: memref<12x128xbf16, #tpu.memory_space<vmem>>, %arg5: memref<6x128xbf16, #tpu.memory_space<vmem>>, %arg6: memref<2x16x128xf32, #tpu.memory_space<vmem>>, %arg7: memref<2x16x128xf32, #tpu.memory_space<vmem>>, %arg8: memref<32x12xf32, #tpu.memory_space<vmem>>) attributes {dimension_semantics = [#tpu.dimension_semantics<parallel>], iteration_bounds = array<i64: 2>, scalar_prefetch = 0 : i64, scratch_operands = 1 : i64, tpu.core_type = #tpu.core_type<tc>, window_params = [{transform_indices = @transform_0, window_bounds = array<i64: 2, 16, 4>}, {transform_indices = @transform_1, window_bounds = array<i64: 2, 16, 16>}, {transform_indices = @transform_2, window_bounds = array<i64: 2, 16, 6>}, {pipeline_mode = #tpu.pipeline_mode<synchronous>, transform_indices = @transform_3, window_bounds = array<i64: 12, 128>}, {pipeline_mode = #tpu.pipeline_mode<synchronous>, transform_indices = @transform_4, window_bounds = array<i64: 6, 128>}, {transform_indices = @transform_5, window_bounds = array<i64: 2, 16, 128>}, {transform_indices = @transform_6, window_bounds = array<i64: 2, 16, 128>}]} {
    %c0 = arith.constant 0 : index
    %c0_0 = arith.constant 0 : index
    %c0_1 = arith.constant 0 : index
    %0 = vector.load %arg1[%c0, %c0_0, %c0_1] : memref<2x16x4xf32, #tpu.memory_space<vmem>>, vector<2x16x4xf32>
    %1 = vector.shape_cast %0 : vector<2x16x4xf32> to vector<32x4xf32>
    %c0_2 = arith.constant 0 : index
    %c0_3 = arith.constant 0 : index
    %2 = vector.load %arg8[%c0_2, %c0_3] : memref<32x12xf32, #tpu.memory_space<vmem>>, vector<32x4xf32>
    tpu.vector_store %arg8[%c0_2, %c0_3], %1 {strides = array<i32>} : memref<32x12xf32, #tpu.memory_space<vmem>>, vector<32x4xf32>,
    %c0_4 = arith.constant 0 : index
    %c0_5 = arith.constant 0 : index
    %c0_6 = arith.constant 0 : index
    %3 = vector.load %arg2[%c0_4, %c0_5, %c0_6] : memref<2x16x16xbf16, #tpu.memory_space<vmem>>, vector<2x16x16xbf16>
    %4 = arith.truncf %0 : vector<2x16x4xf32> to vector<2x16x4xbf16>
    "tpu.trace_start"() <{level = 10 : i32, message = "gij,gjd->gid"}> : () -> ()
    %cst = arith.constant dense<0.000000e+00> : vector<2x16x4xf32>
    %5 = tpu.matmul %3, %4, %cst {dimension_numbers = #tpu.dot_dimension_numbers<[2], [1], [1], [2], [0, 0, 0, 1, 1, 2], [0], [0]>} : vector<2x16x16xbf16>, vector<2x16x4xbf16>, vector<2x16x4xf32> -> vector<2x16x4xf32>
    "tpu.trace_stop"() : () -> ()
    %6 = vector.shape_cast %5 : vector<2x16x4xf32> to vector<32x4xf32>
    %c0_7 = arith.constant 0 : index
    %c4 = arith.constant 4 : index
    %7 = vector.load %arg8[%c0_7, %c4] : memref<32x12xf32, #tpu.memory_space<vmem>>, vector<32x4xf32>
    tpu.vector_store %arg8[%c0_7, %c4], %6 {strides = array<i32>} : memref<32x12xf32, #tpu.memory_space<vmem>>, vector<32x4xf32>,
    %8 = arith.truncf %5 : vector<2x16x4xf32> to vector<2x16x4xbf16>
    "tpu.trace_start"() <{level = 10 : i32, message = "gij,gjd->gid"}> : () -> ()
    %cst_8 = arith.constant dense<0.000000e+00> : vector<2x16x4xf32>
    %9 = tpu.matmul %3, %8, %cst_8 {dimension_numbers = #tpu.dot_dimension_numbers<[2], [1], [1], [2], [0, 0, 0, 1, 1, 2], [0], [0]>} : vector<2x16x16xbf16>, vector<2x16x4xbf16>, vector<2x16x4xf32> -> vector<2x16x4xf32>
    "tpu.trace_stop"() : () -> ()
    %10 = vector.shape_cast %9 : vector<2x16x4xf32> to vector<32x4xf32>
    %c0_9 = arith.constant 0 : index
    %c8 = arith.constant 8 : index
    %11 = vector.load %arg8[%c0_9, %c8] : memref<32x12xf32, #tpu.memory_space<vmem>>, vector<32x4xf32>
    tpu.vector_store %arg8[%c0_9, %c8], %10 {strides = array<i32>} : memref<32x12xf32, #tpu.memory_space<vmem>>, vector<32x4xf32>,
    %c0_10 = arith.constant 0 : index
    %c0_11 = arith.constant 0 : index
    %12 = vector.load %arg8[%c0_10, %c0_11] : memref<32x12xf32, #tpu.memory_space<vmem>>, vector<32x12xf32>
    %13 = arith.truncf %12 : vector<32x12xf32> to vector<32x12xbf16>
    %c0_12 = arith.constant 0 : index
    %c0_13 = arith.constant 0 : index
    %14 = vector.load %arg4[%c0_12, %c0_13] : memref<12x128xbf16, #tpu.memory_space<vmem>>, vector<12x128xbf16>
    %cst_14 = arith.constant dense<0.000000e+00> : vector<32x128xf32>
    %15 = tpu.matmul %13, %14, %cst_14 {dimension_numbers = #tpu.dot_dimension_numbers<[1], [0], [0], [1], [0, 0, 1, 1], [], []>} : vector<32x12xbf16>, vector<12x128xbf16>, vector<32x128xf32> -> vector<32x128xf32>
    %16 = vector.shape_cast %15 : vector<32x128xf32> to vector<2x16x128xf32>
    %c0_15 = arith.constant 0 : index
    %c0_16 = arith.constant 0 : index
    %c0_17 = arith.constant 0 : index
    %17 = vector.load %arg6[%c0_15, %c0_16, %c0_17] : memref<2x16x128xf32, #tpu.memory_space<vmem>>, vector<2x16x128xf32>
    tpu.vector_store %arg6[%c0_15, %c0_16, %c0_17], %16 {strides = array<i32>} : memref<2x16x128xf32, #tpu.memory_space<vmem>>, vector<2x16x128xf32>,
    %c0_18 = arith.constant 0 : index
    %c0_19 = arith.constant 0 : index
    %c0_20 = arith.constant 0 : index
    %18 = vector.load %arg3[%c0_18, %c0_19, %c0_20] : memref<2x16x6xbf16, #tpu.memory_space<vmem>>, vector<2x16x6xbf16>
    %19 = vector.shape_cast %18 : vector<2x16x6xbf16> to vector<32x6xbf16>
    %c0_21 = arith.constant 0 : index
    %c0_22 = arith.constant 0 : index
    %20 = vector.load %arg5[%c0_21, %c0_22] : memref<6x128xbf16, #tpu.memory_space<vmem>>, vector<6x128xbf16>
    %cst_23 = arith.constant dense<0.000000e+00> : vector<32x128xf32>
    %21 = tpu.matmul %19, %20, %cst_23 {dimension_numbers = #tpu.dot_dimension_numbers<[1], [0], [0], [1], [0, 0, 1, 1], [], []>} : vector<32x6xbf16>, vector<6x128xbf16>, vector<32x128xf32> -> vector<32x128xf32>
    %22 = vector.shape_cast %21 : vector<32x128xf32> to vector<2x16x128xf32>
    %c0_24 = arith.constant 0 : index
    %c0_25 = arith.constant 0 : index
    %c0_26 = arith.constant 0 : index
    %23 = vector.load %arg7[%c0_24, %c0_25, %c0_26] : memref<2x16x128xf32, #tpu.memory_space<vmem>>, vector<2x16x128xf32>
    tpu.vector_store %arg7[%c0_24, %c0_25, %c0_26], %22 {strides = array<i32>} : memref<2x16x128xf32, #tpu.memory_space<vmem>>, vector<2x16x128xf32>,
    return
  }
  func.func @transform_0(%arg0: i32) -> (i32, i32, i32) {
    %c0_i32 = arith.constant 0 : i32
    %c0_i32_0 = arith.constant 0 : i32
    %c0_i32_1 = arith.constant 0 : i32
    return %arg0, %c0_i32, %c0_i32_0 : i32, i32, i32
  }
  func.func @transform_1(%arg0: i32) -> (i32, i32, i32) {
    %c0_i32 = arith.constant 0 : i32
    %c0_i32_0 = arith.constant 0 : i32
    %c0_i32_1 = arith.constant 0 : i32
    return %arg0, %c0_i32, %c0_i32_0 : i32, i32, i32
  }
  func.func @transform_2(%arg0: i32) -> (i32, i32, i32) {
    %c0_i32 = arith.constant 0 : i32
    %c0_i32_0 = arith.constant 0 : i32
    %c0_i32_1 = arith.constant 0 : i32
    return %arg0, %c0_i32, %c0_i32_0 : i32, i32, i32
  }
  func.func @transform_3(%arg0: i32) -> (i32, i32) {
    %c0_i32 = arith.constant 0 : i32
    %c0_i32_0 = arith.constant 0 : i32
    %c0_i32_1 = arith.constant 0 : i32
    return %c0_i32, %c0_i32_0 : i32, i32
  }
  func.func @transform_4(%arg0: i32) -> (i32, i32) {
    %c0_i32 = arith.constant 0 : i32
    %c0_i32_0 = arith.constant 0 : i32
    %c0_i32_1 = arith.constant 0 : i32
    return %c0_i32, %c0_i32_0 : i32, i32
  }
  func.func @transform_5(%arg0: i32) -> (i32, i32, i32) {
    %c0_i32 = arith.constant 0 : i32
    %c0_i32_0 = arith.constant 0 : i32
    %c0_i32_1 = arith.constant 0 : i32
    return %arg0, %c0_i32, %c0_i32_0 : i32, i32, i32
  }
  func.func @transform_6(%arg0: i32) -> (i32, i32, i32) {
    %c0_i32 = arith.constant 0 : i32
    %c0_i32_0 = arith.constant 0 : i32
    %c0_i32_1 = arith.constant 0 : i32
    return %arg0, %c0_i32, %c0_i32_0 : i32, i32, i32
  }
}

</mosaic_0001>

<bundles_post_ra>
// kernel: tpu_custom_call.1
= control target key start
LH: loop header
LB: loop body
LE: loop exit
PB: predicated region body
PF: predicated region fallthrough
CT: control target
= control target key end

     0   :  { %12 = vsyncpa [#allocation4], 0  ;;  %s1337_s0 = inlined_call_operand.vmem [shape: f32[4,16,4], index: 0, kind: input, shape index: {}]   ;;  %s1338_s1 = inlined_call_operand.vmem [shape: bf16[4,16,16], index: 1, kind: input, shape index: {}]   ;;  %s1339_s2 = inlined_call_operand.vmem [shape: bf16[4,16,6], index: 2, kind: input, shape index: {}]   ;;  %s1340_s3 = inlined_call_operand.vmem [shape: bf16[12,128], index: 3, kind: input, shape index: {}]   ;;  %s1341_s4 = inlined_call_operand.vmem [shape: bf16[6,128], index: 4, kind: input, shape index: {}]   ;;  %s1342_s5 = inlined_call_operand.hbm [shape: f32[4,16,128], index: 5, kind: output, shape index: {0}]   ;;  %s1343_s6 = inlined_call_operand.hbm [shape: f32[4,16,128], index: 6, kind: output, shape index: {1}]  }
   0x1   :  { %14 = vsyncpa [#allocation4 + $0x1], 0 }
   0x2   :  { %15 = vsyncpa [#allocation6], 0 }
   0x3   :  { %17 = vsyncpa [#allocation6 + $0x1], 0  ;;  %s1159_s21 = smov 0   ;;  %s1161_s22 = smov 0  }
   0x4   :  { %s1163_s23 = smov 0   ;;  %s1165_s24 = smov 0  }
   0x5 LB: > { %s1180_s25 = sadd.s32 4294967295, %s1115_s24   ;;  %s870_s26 = sadd.s32 4294967294, %s1115_s24   ;;  %s1115_s24 = sphi %s1165_s24, %s1349_s24   ;;  %s1111_s23 = sphi %s1163_s23, %s1348_s23   ;;  %s1107_s22 = sphi %s1161_s22, %s1347_s22   ;;  %s1103_s21 = sphi %s1159_s21, %s1346_s21  }
   0x6   : > { %s1184_s27 = sadd.s32 1, %s1115_s24   ;;  %s150_s28 = sadd.s32 1, %s1111_s23 }
   0x7   : > { %s147_s29 = ssub.s32 %s1115_s24, %s1184_s27  ;;  %p160_p0 = scmp.ne.s32.totalorder %s1111_s23, %s1107_s22 }
   0x8   : > { %p148_p1 = scmp.eq.s32.totalorder %s147_s29, 0  ;;  %p161_p2 = scmp.eq.s32.totalorder %s1180_s25, 1 }
   0x9   : > { %p166_p3 = scmp.ne.s32.totalorder %s1107_s22, %s1103_s21  ;;  %p167_p4 = scmp.eq.s32.totalorder %s870_s26, 1 }
   0xa   : > { %s1195_s30 = scalar_select %p148_p1, %s1111_s23, %s150_s28  }
   0xb   : > { %p1197_p5 = por %p161_p2, %p160_p0  ;;  %p1201_p6 = por %p167_p4, %p166_p3 }
   0xc   : > { %p873_p7 = scmp.ge.s32.totalorder %s1115_s24, 1  ;;  %p247_p8 = scmp.lt.s32.totalorder %s1115_s24, 3 }
   0xe   : > { %p248_p9 = pnand %p873_p7, %p247_p8 }
   0xf   : > { %s876_s9 = sshll.u32 (!%p248_p9), %s1180_s25, 1  ;;  %v1117_v0 = vmov (!%p248_p9), 0.0   ;;  %vm1118_vm0 = vmmov (!%p248_p9), 0   ;;  %vm323_vm1 = vcmask (!%p248_p9), 31744   ;;  %vm339_vm2 = vcmask (!%p248_p9), 130048   ;;  %s1119_s26 = smov (!%p248_p9), 4  }
  0x10   : > { %251 = sbr.rel (%p248_p9) target bundleno = 823 (0x337), region = 40  ;;  %929 = vmatprep.subr.bf16.mxu0 (!%p248_p9), %v1117_v0  ;;  %935 = vmatprep.subr.bf16.mxu1 (!%p248_p9), %v1117_v0  ;;  %p296_p10 = scmp.lt.s32.totalorder (!%p248_p9), %s876_s9, 3  ;;  %vm449_vm3 = vcmask (!%p248_p9), 64544   ;;  %v1018_v23 = vld [vmem:[%s1340_s3] sm:$0x3f] (!%p248_p9)   ;;  %vm579_vm4 = vcmask (!%p248_p9), 1045504  }
  0x11   : > { %931 = vmatprep.mubr.msk.bf16.mxu0 (!%p248_p9), %vm1118_vm0, %v1117_v0  ;;  %937 = vmatprep.mubr.msk.bf16.mxu1 (!%p248_p9), %vm1118_vm0, %v1117_v0  ;;  %v640_v24 = vld [vmem:[%s1341_s4] sm:$0x7] (!%p248_p9)  ;;  %vm658_vm5 = vcmask (!%p248_p9), 1042432   ;;  %v581_v26 = vsel (!%p248_p9), %vm579_vm4, %v1018_v23, 0  ;;  %vm651_vm6 = vcmask (!%p248_p9), 48128   ;;  %vm554_vm7 = vcmask (!%p248_p9), 97344  }
  0x12   : > { %v660_v25 = vsel (!%p248_p9), %vm658_vm5, %v640_v24, 0  ;;  %vm572_vm8 = vcmask (!%p248_p9), 97280   ;;  %s1240_s12 = sand.u32 (!%p248_p9), 1, %s1107_s22   ;;  %s912_s16 = sshll.u32 (!%p248_p9), %s1180_s25, 9 }
  0x13   : > { %s874_s13 = sshll.u32 (!%p248_p9), %s1240_s12, 5  ;;  %s1253_s19 = scalar_lea.hbm (!%p248_p9), %s1343_s6, %s912_s16 }
  0x14   : > { %s1121_s28 = smov (!%p248_p9), [#allocation5]  }
  0x15   : > { %s1025_s29 = sshll.u32 (!%p248_p9), %s1121_s28, 4  ;;  %s1026_s29 = int_to_ptr.vmem [resolvable:$false] %s1025_s29 }
  0x17   : > { %s1351_s9 = smov (!%p296_p10, %s876_s9), 3 }
  0x18   : > { %s908_s10 = sshll.u32 %s1351_s9, 4  ;;  %s909_s11 = sshll.u32 %s1351_s9, 3 }
  0x19   : > { %s300_s14 = scalar_lea.vmem %s1337_s0, %s908_s10  ;;  %s307_s17 = scalar_lea.vmem %s1338_s1, %s909_s11 }
  0x1a   : > { %v319_v1 = vld [vmem:[%s300_s14] sm:$0xff]  ;;  %v320_v2 = vld [vmem:[%s300_s14 + $0x8] sm:$0xff]  ;;  %v321_v3 = vld [vmem:[%s300_s14 + $0x10] sm:$0xff]  ;;  %s1219_s20 = scalar_lea.vmem %s1339_s2, %s909_s11  ;;  %s1120_s11 = smov 8  }
  0x1b   : > { %324 = vst.msk [vmem:[#allocation2] sm:$0xff] %vm323_vm1, %v319_v1  ;;  %325 = vst.msk [vmem:[#allocation2 + $0x8] sm:$0xff] %vm323_vm1, %v320_v2  ;;  %v332_v4 = vpack.c.bf16 %v320_v2, %v319_v1  ;;  %v322_v5 = vld [vmem:[%s300_s14 + $0x18] sm:$0xff]  ;;  %v1016_v7 = vld [vmem:[%s307_s17] sm:$0xff]   ;;  %s294_s14 = scalar_lea.vmem [#allocation5], %s874_s13  ;;  %s1027_s9 = scalar_lea.vmem %s1026_s29, 1024 }
  0x1c   : > { %326 = vst.msk [vmem:[#allocation2 + $0x10] sm:$0xff] %vm323_vm1, %v321_v3  ;;  %327 = vst.msk [vmem:[#allocation2 + $0x18] sm:$0xff] %vm323_vm1, %v322_v5  ;;  %v333_v6 = vpack.c.bf16 %v322_v5, %v321_v3  ;;  %v1017_v8 = vld [vmem:[%s307_s17 + $0x8] sm:$0xff]   ;;  %v1019_v27 = vld [vmem:[%s1219_s20] sm:$0xff]   ;;  %s752_s15 = sshll.u32 %s294_s14, 4  ;;  %s1245_s15 = int_to_ptr.vmem [resolvable:$true] %s752_s15 }
  0x1d   : > { %930 = vmatpush3.bf16.msra.mxu0 %v332_v4  ;;  %v1020_v29 = vld [vmem:[%s1219_s20 + $0x8] sm:$0xff]   ;;  %s721_s20 = scalar_lea.sflag [#allocation6], %s1240_s12  ;;  %p1028_p0 = scmp.lt.s32.totalorder %s1245_s15, %s1026_s29 }
  0x1e   : > { %936 = vmatpush3.bf16.msra.mxu1 %v333_v6  ;;  %941 = vmatprep.subr.bf16.mxu0 %v1117_v0 }
  0x1f   : > { %947 = vmatprep.subr.bf16.mxu1 %v1117_v0 }
  0x20   : > { %932 = vmatmul.mubr.msk.bf16.vlgmr.msra.gmra.mrb[0].mxu0 %vm339_vm2, %v1016_v7 }
  0x21   : > { %938 = vmatmul.mubr.msk.bf16.vlgmr.msra.gmra.mrb[0].mxu1 %vm339_vm2, %v1017_v8  ;;  %943 = vmatprep.mubr.msk.bf16.mxu0 %vm1118_vm0, %v1117_v0 }
  0x22   : > { %949 = vmatprep.mubr.msk.bf16.mxu1 %vm1118_vm0, %v1117_v0 }
  0xf3   : > { %v377_v9 = vpop.f32.mrb[0].mxu0 }
  0xf4   : > { %v426_v10 = vpop.f32.mrb[0].mxu1  ;;  %437 = vrot.lane.b32.xlu0 %v377_v9, %s1119_s26  ;;  %v933_v11 = vpop.f32.mrb[1].mxu0 }
  0xf5   : > { %441 = vrot.lane.b32.xlu1 %v426_v10, %s1119_s26  ;;  %v380_v12 = vpop.f32.mrb[2].mxu0  ;;  %v939_v13 = vpop.f32.mrb[1].mxu1 }
  0xf6   : > { %v454_v14 = vpack.c.bf16 %v380_v12, %v377_v9  ;;  %v934_v15 = vpop.f32.mrb[3].mxu0  ;;  %v429_v16 = vpop.f32.mrb[2].mxu1 }
  0xf7   : > { %v455_v17 = vpack.c.bf16 %v429_v16, %v426_v10  ;;  %v940_v18 = vpop.f32.mrb[3].mxu1 }
  0xf8   : > { %439 = vrot.lane.b32.xlu0 %v380_v12, %s1119_s26  ;;  %942 = vmatpush3.bf16.msra.mxu0 %v454_v14 }
  0xf9   : > { %443 = vrot.lane.b32.xlu1 %v429_v16, %s1119_s26  ;;  %948 = vmatpush3.bf16.msra.mxu1 %v455_v17  ;;  %s1021_s26 = scalar_lea.vmem %s1245_s15, 512 }
  0xfa   : > { %966 = vmatprep.subr.msk.bf16.mxu1 %vm658_vm5, %v640_v24  ;;  %965 = vmatprep.subr.msk.bf16.mxu0 %vm579_vm4, %v1018_v23  ;;  %p1022_p11 = scmp.ne.s32.totalorder %s1245_s15, %s1021_s26  ;;  %p1029_p1 = scmp.lt.s32.totalorder %s1027_s9, %s1021_s26 }
  0xfb   : > { %944 = vmatmul.mubr.msk.bf16.vlgmr.msra.gmra.mrb[4].mxu0 %vm339_vm2, %v1016_v7 }
  0xfc   : > { %950 = vmatmul.mubr.msk.bf16.vlgmr.msra.gmra.mrb[4].mxu1 %vm339_vm2, %v1017_v8  ;;  %954 = vmatpush3.bf16.msra.mxu0 %v581_v26  ;;  %p1023_p12 = pnand %p1022_p11, %p1197_p5  ;;  %p1030_p2 = por %p1029_p1, %p1028_p0 }
  0xfd   : > { %960 = vmatpush3.bf16.msra.mxu1 %v660_v25  ;;  %961 = vmatprep.mubr.msk.bf16.mxu1 %vm651_vm6, %v1019_v27 }
  0xfe   : > { %p1024_p13 = pneg %p1023_p12 }
 0x100   : > { %p1031_p3 = pnand %p1030_p2, %p1024_p13 }
 0x104   : > { %962 = vmatmul.mubr.msk.bf16.vlgmr.msra.gmra.mrb[8].mxu1 %vm651_vm6, %v1020_v29 }
 0x166   : > { %v438_v19 = vpop.permute.xlu0 %437 }
 0x167   : > { %v442_v20 = vpop.permute.xlu1 %441  ;;  %450 = vst.msk [vmem:[#allocation2] sm:$0xff] %vm449_vm3, %v438_v19 }
 0x168   : > { %452 = vst.msk [vmem:[#allocation2 + $0x10] sm:$0xff] %vm449_vm3, %v442_v20 }
 0x16a   : > { %v440_v21 = vpop.permute.xlu0 %439 }
 0x16b   : > { %v444_v22 = vpop.permute.xlu1 %443  ;;  %451 = vst.msk [vmem:[#allocation2 + $0x8] sm:$0xff] %vm449_vm3, %v440_v21 }
 0x16c   : > { %453 = vst.msk [vmem:[#allocation2 + $0x18] sm:$0xff] %vm449_vm3, %v444_v22 }
 0x1ce   : > { %v490_v28 = vpop.f32.mrb[4].mxu0 }
 0x1cf   : > { %v945_v30 = vpop.f32.mrb[5].mxu0  ;;  %542 = vrot.lane.b32.xlu0 %v490_v28, %s1120_s11  ;;  %v531_v31 = vpop.f32.mrb[4].mxu1 }
 0x1d0   : > { %v493_v32 = vpop.f32.mrb[6].mxu0  ;;  %v951_v33 = vpop.f32.mrb[5].mxu1 }
 0x1d1   : > { %544 = vrot.lane.b32.xlu1 %v493_v32, %s1120_s11  ;;  %v946_v34 = vpop.f32.mrb[7].mxu0  ;;  %v534_v35 = vpop.f32.mrb[6].mxu1 }
 0x1d2   : > { %v952_v36 = vpop.f32.mrb[7].mxu1 }
 0x1d3   : > { %546 = vrot.lane.b32.xlu0 %v531_v31, %s1120_s11 }
 0x1d5   : > { %548 = vrot.lane.b32.xlu1 %v534_v35, %s1120_s11 }
 0x1d7   : > { %v963_v47 = vpop.f32.mrb[8].mxu1 }
 0x1d8   : > { %v696_v48 = vpop.f32.mrb[9].mxu1  ;;  %713 = vst [vmem:[%s294_s14 + $0x10] sm:$0xff] %v963_v47 }
 0x1d9   : > { %v964_v49 = vpop.f32.mrb[10].mxu1  ;;  %711 = vst [vmem:[%s294_s14] sm:$0xff] %v696_v48 }
 0x1da   : > { %v699_v50 = vpop.f32.mrb[11].mxu1  ;;  %714 = vst [vmem:[%s294_s14 + $0x18] sm:$0xff] %v964_v49 }
 0x1db   : > { %712 = vst [vmem:[%s294_s14 + $0x8] sm:$0xff] %v699_v50 }
 0x241   : > { %v543_v37 = vpop.permute.xlu0 %542 }
 0x242   : > { %555 = vst.msk [vmem:[#allocation2] sm:$0xff] %vm554_vm7, %v543_v37 }
 0x243   : > { %v545_v38 = vpop.permute.xlu1 %544 }
 0x244   : > { %556 = vst.msk [vmem:[#allocation2 + $0x8] sm:$0xff] %vm554_vm7, %v545_v38 }
 0x245   : > { %v547_v39 = vpop.permute.xlu0 %546 }
 0x246   : > { %557 = vst.msk [vmem:[#allocation2 + $0x10] sm:$0xff] %vm554_vm7, %v547_v39 }
 0x247   : > { %v549_v40 = vpop.permute.xlu1 %548 }
 0x248   : > { %558 = vst.msk [vmem:[#allocation2 + $0x18] sm:$0xff] %vm554_vm7, %v549_v40 }
 0x249   : > { %v559_v41 = vld [vmem:[#allocation2] sm:$0xff] }
 0x24b   : > { %v560_v42 = vld [vmem:[#allocation2 + $0x8] sm:$0xff] }
 0x24c   : > { %v563_v43 = vpack.c.bf16 %v560_v42, %v559_v41 }
 0x24d   : > { %v561_v44 = vld [vmem:[#allocation2 + $0x10] sm:$0xff] }
 0x24e   : > { %955 = vmatprep.mubr.msk.bf16.mxu0 %vm572_vm8, %v563_v43 }
 0x24f   : > { %v562_v45 = vld [vmem:[#allocation2 + $0x18] sm:$0xff] }
 0x250   : > { %v564_v46 = vpack.c.bf16 %v562_v45, %v561_v44 }
 0x252   : > { %956 = vmatmul.mubr.msk.bf16.vlgmr.msra.gmra.mrb[8].mxu0 %vm572_vm8, %v564_v46 }
 0x253   : > { %1034 = shalt.err (!%p1031_p3)
}
 0x254   : > { %s1035_s10 = scalar_lea.hbm %s1253_s19, 512  ;;  %s1039_s18 = scalar_lea.hbm %s1343_s6, 1024 }
 0x255   : > { %p1036_p4 = scmp.ne.s32.totalorder %s1253_s19, %s1035_s10  ;;  %p1040_p9 = scmp.lt.u32.totalorder %s1253_s19, %s1343_s6 }
 0x256   : > { %p1041_p10 = scmp.lt.u32.totalorder %s1039_s18, %s1035_s10  ;;  %p1043_p12 = scmp.lt.u32.totalorder %s1035_s10, %s1253_s19 }
 0x257   : > { %p1037_p7 = pnand %p1036_p4, %p1197_p5 }
 0x258   : > { %p1042_p11 = por %p1041_p10, %p1040_p9 }
 0x259   : > { %p1038_p8 = pneg %p1037_p7 }
 0x25a   : > { %p1044_p13 = por %p1043_p12, %p1042_p11 }
 0x25c   : > { %p1045_p0 = pnand %p1044_p13, %p1038_p8 }
 0x25e   : > { %1048 = shalt.err (!%p1045_p0)
}
 0x25f   : > { %s1122_s26 = smov 128   ;;  %s287_s9 = scalar_lea.vmem [#allocation3], %s874_s13 }
 0x260   : > { %968 = dma.vmem_to_hbm [thread:$0]  (%p1197_p5), %s1245_s15, 512, %s1253_s19, %s721_s20, %s1122_s26, %s1122_s26, %s1120_s11  }
 0x261   : > { %s735_s10 = sshll.u32 %s287_s9, 4  ;;  %s1291_s18 = scalar_lea.hbm %s1342_s5, %s912_s16  ;;  %s1284_s10 = int_to_ptr.vmem [resolvable:$true] %s735_s10 }
 0x262   : > { %s716_s13 = scalar_lea.sflag [#allocation4], %s1240_s12  ;;  %s1049_s15 = scalar_lea.vmem %s1284_s10, 512 }
 0x263   : > { %p1050_p1 = scmp.ne.s32.totalorder %s1284_s10, %s1049_s15  ;;  %s1123_s19 = smov [#allocation3]  }
 0x264   : > { %s1053_s20 = sshll.u32 %s1123_s19, 4  ;;  %s1054_s20 = int_to_ptr.vmem [resolvable:$false] %s1053_s20 }
 0x265   : > { %p1051_p2 = pnand %p1050_p1, %p1197_p5  ;;  %s1055_s28 = scalar_lea.vmem %s1054_s20, 1024 }
 0x266   : > { %p1056_p4 = scmp.lt.s32.totalorder %s1284_s10, %s1054_s20  ;;  %p1057_p7 = scmp.lt.s32.totalorder %s1055_s28, %s1049_s15 }
 0x267   : > { %p1052_p3 = pneg %p1051_p2 }
 0x268   : > { %p1058_p8 = por %p1057_p7, %p1056_p4 }
 0x26a   : > { %p1059_p9 = pnand %p1058_p8, %p1052_p3 }
 0x325   : > { %v957_v51 = vpop.f32.mrb[8].mxu0 }
 0x326   : > { %634 = vst [vmem:[%s287_s9 + $0x10] sm:$0xff] %v957_v51  ;;  %v617_v52 = vpop.f32.mrb[9].mxu0 }
 0x327   : > { %632 = vst [vmem:[%s287_s9] sm:$0xff] %v617_v52  ;;  %v958_v53 = vpop.f32.mrb[10].mxu0 }
 0x328   : > { %635 = vst [vmem:[%s287_s9 + $0x18] sm:$0xff] %v958_v53  ;;  %v620_v54 = vpop.f32.mrb[11].mxu0 }
 0x329   : > { %633 = vst [vmem:[%s287_s9 + $0x8] sm:$0xff] %v620_v54 }
 0x32a   : > { %1062 = shalt.err (!%p1059_p9)
}
 0x32b   : > { %s1063_s25 = scalar_lea.hbm %s1291_s18, 512  ;;  %s1067_s9 = scalar_lea.hbm %s1342_s5, 1024 }
 0x32c   : > { %p1064_p10 = scmp.ne.s32.totalorder %s1291_s18, %s1063_s25  ;;  %p1068_p13 = scmp.lt.u32.totalorder %s1291_s18, %s1342_s5 }
 0x32d   : > { %p1069_p0 = scmp.lt.u32.totalorder %s1067_s9, %s1063_s25  ;;  %p1071_p2 = scmp.lt.u32.totalorder %s1063_s25, %s1291_s18 }
 0x32e   : > { %p1065_p11 = pnand %p1064_p10, %p1197_p5 }
 0x32f   : > { %p1070_p1 = por %p1069_p0, %p1068_p13 }
 0x330   : > { %p1066_p12 = pneg %p1065_p11 }
 0x331   : > { %p1072_p3 = por %p1071_p2, %p1070_p1 }
 0x333   : > { %p1073_p4 = pnand %p1072_p3, %p1066_p12 }
 0x335   : > { %1076 = shalt.err (!%p1073_p4)
}
 0x336   : > { %967 = dma.vmem_to_hbm [thread:$0]  (%p1197_p5), %s1284_s10, 512, %s1291_s18, %s716_s13, %s1122_s26, %s1122_s26, %s1120_s11  }
 0x337 PF: > { %p978_p7 = scmp.ge.s32.totalorder %s1115_s24, 2  ;;  %s767_s15 = sand.u32 1, %s1103_s21  }
 0x338   : > { %s768_s19 = scalar_lea.sflag [#allocation4], %s767_s15 }
 0x339   : > { %p972_p8 = pnand %p978_p7, %p1201_p6 }
 0x33b   : > { %1094 = dma.done.wait (!%p972_p8), %s768_s19, 512  }
 0x33c   : > { %1096 = vsyncadd (!%p972_p8), %s768_s19, 4294966784  ;;  %s777_s7 = scalar_lea.sflag [#allocation6], %s767_s15 }
 0x33d   : > { %1098 = dma.done.wait (!%p972_p8), %s777_s7, 512  }
 0x33e   : > { %1100 = vsyncadd (!%p972_p8), %s777_s7, 4294966784  ;;  %p20_p5 = scmp.ge.s32.totalorder %s1184_s27, 4   ;;  %s1346_s21 = smov %s1107_s22 }
 0x33f   : > { %s1347_s22 = smov %s1111_s23  ;;  %s1348_s23 = smov %s1195_s30 }
 0x340   : > { %s1349_s24 = smov %s1184_s27  ;;  %22 = sbr.rel (!%p20_p5) target bundleno = 5 (0x5), region = 98 }
 0x347   :  { %782 = vsyncpa [#allocation4], 1 }
 0x348   :  { %784 = vsyncpa [#allocation4 + $0x1], 1 }
 0x349   :  { %785 = vsyncpa [#allocation6], 1 }
 0x34a   :  { %787 = vsyncpa [#allocation6 + $0x1], 1 }

</bundles_post_ra>
